<compile_context>
chip_gen: v7x
topology: tpu7x:2x2x1
jax: 0.10.0
libtpu: 0.0.40
codegen_flags: <defaults>
</compile_context>

<pallas_src>
import functools

import jax
import jax.numpy as jnp
from jax.experimental import pallas as pl
from jax.experimental.pallas import tpu as pltpu


def _round_up(x, m):
    return ((x + m - 1) // m) * m


def _choose_batch_tile(B, batch_tile):
    """Pick the per-step batch tile.

    Small B  -> one tile covering the batch, 16-row granularity (bf16 packing).
    Large B  -> 128-aligned tiles, capped at `batch_tile`, and at least two
                tiles so the "parallel" axis can split across v7x's two TCs.
    """
    b16 = _round_up(B, 16)
    if b16 <= 256:
        return b16
    tb = _round_up((B + 1) // 2, 128)
    return int(max(128, min(batch_tile, tb)))


def _actor_kernel(x_ref, w1_ref, b1_ref, w2_ref, b2_ref, w3_ref, b3_ref,
                  out_ref, *, max_action, action_dim):
    # State tile arrives f32; cast to bf16 in-kernel (cheap VPU op, hidden
    # under the MXU) so the wrapper launches no extra cast op.
    x = x_ref[...].astype(jnp.bfloat16)

    # Layer 1: [tb, S](bf16) @ [S, H](bf16) -> f32 accumulate; bf16 epilogue.
    h1 = jnp.dot(x, w1_ref[...], preferred_element_type=jnp.float32)
    h1 = jnp.maximum(h1.astype(jnp.bfloat16) + b1_ref[...], 0)

    # Layer 2: [tb, H] @ [H, H]; bf16 epilogue.
    h2 = jnp.dot(h1, w2_ref[...], preferred_element_type=jnp.float32)
    h2 = jnp.maximum(h2.astype(jnp.bfloat16) + b2_ref[...], 0)

    # Layer 3: [tb, H] @ [H, A_pad] on the MXU, then slice back to the true
    # action width before the f32 epilogue and store (unpadded output).
    h3 = jnp.dot(h2, w3_ref[...], preferred_element_type=jnp.float32)
    h3 = h3[:, :action_dim] + b3_ref[...]

    # Exact sigmoid (matches torch.sigmoid / jax.nn.sigmoid numerics).
    sig = 1.0 / (1.0 + jnp.exp(-h3))
    out_ref[...] = (max_action * sig).astype(out_ref.dtype)


def prepare_actor_params(params, lane_pad=128):
    """One-time preparation: bf16 weights/biases, 128-lane-padded w3.

    Called once outside the hot path so the forward launches a single op.
    """
    A = params["w3"].shape[1]
    A_pad = max(lane_pad, _round_up(A, lane_pad))
    bf = jnp.bfloat16
    return {
        "w1": params["w1"].astype(bf),
        "b1": params["b1"].astype(bf),
        "w2": params["w2"].astype(bf),
        "b2": params["b2"].astype(bf),
        "w3": jnp.pad(params["w3"].astype(bf), ((0, 0), (0, A_pad - A))),
        "b3": params["b3"],  # f32, unpadded: final epilogue stays f32
    }


def actor_forward(state, prepared, max_action, *, batch_tile=2048):
    """Fused 3-layer Actor MLP forward.

    state:    [B, state_dim] float32
    prepared: output of prepare_actor_params (bf16 weights, padded w3).
    max_action: static Python number (baked into the kernel).
    """
    B, S = state.shape
    H = prepared["w1"].shape[1]
    A = prepared["b3"].shape[1]
    A_pad = prepared["w3"].shape[1]

    tb = _choose_batch_tile(B, batch_tile)
    grid = (pl.cdiv(B, tb),)

    kernel = functools.partial(
        _actor_kernel, max_action=float(max_action), action_dim=A)

    # Constant index_map -> block is fetched once and stays VMEM-resident
    # across all batch tiles.
    const = lambda shape: pl.BlockSpec(shape, lambda i: (0,) * len(shape))

    return pl.pallas_call(
        kernel,
        out_shape=jax.ShapeDtypeStruct((B, A), jnp.float32),
        grid=grid,
        in_specs=[
            pl.BlockSpec((tb, S), lambda i: (i, 0)),   # batch-tiled state (f32)
            const((S, H)), const((1, H)),              # layer 1 (bf16)
            const((H, H)), const((1, H)),              # layer 2 (bf16)
            const((H, A_pad)), const((1, A)),          # layer 3 (padded w3, f32 b3)
        ],
        out_specs=pl.BlockSpec((tb, A), lambda i: (i, 0)),  # true-width output
        compiler_params=pltpu.CompilerParams(
            dimension_semantics=("parallel",)),        # megacore batch split
    )(state, prepared["w1"], prepared["b1"], prepared["w2"], prepared["b2"],
      prepared["w3"], prepared["b3"])


def init_actor_params(key, state_dim, action_dim, hidden=256):
    """PyTorch nn.Linear-style init (uniform +/- 1/sqrt(fan_in)).

    Weights stored transposed ([in, out]) so the kernel does x @ W directly.
    """
    ks = jax.random.split(key, 6)

    def linear(kw, kb, fan_in, fan_out):
        bound = 1.0 / jnp.sqrt(jnp.float32(fan_in))
        w = jax.random.uniform(kw, (fan_in, fan_out), jnp.float32, -bound, bound)
        b = jax.random.uniform(kb, (1, fan_out), jnp.float32, -bound, bound)
        return w, b

    w1, b1 = linear(ks[0], ks[1], state_dim, hidden)
    w2, b2 = linear(ks[2], ks[3], hidden, hidden)
    w3, b3 = linear(ks[4], ks[5], hidden, action_dim)
    return {"w1": w1, "b1": b1, "w2": w2, "b2": b2, "w3": w3, "b3": b3}


def actor_ref_f32(state, params, max_action):
    """Exact f32 semantics of the PyTorch module."""
    a = jax.nn.relu(state @ params["w1"] + params["b1"])
    a = jax.nn.relu(a @ params["w2"] + params["b2"])
    return max_action * jax.nn.sigmoid(a @ params["w3"] + params["b3"])


def actor_ref_bf16(state, params, max_action):
    """Reference replicating the kernel's bf16 matmul inputs and epilogues."""
    bf = jnp.bfloat16
    x = state.astype(bf)
    h1 = jnp.dot(x, params["w1"].astype(bf), preferred_element_type=jnp.float32)
    h1 = jnp.maximum(h1.astype(bf) + params["b1"].astype(bf), 0)
    h2 = jnp.dot(h1, params["w2"].astype(bf), preferred_element_type=jnp.float32)
    h2 = jnp.maximum(h2.astype(bf) + params["b2"].astype(bf), 0)
    h3 = jnp.dot(h2, params["w3"].astype(bf), preferred_element_type=jnp.float32)
    h3 = h3.astype(jnp.float32) + params["b3"]
    return max_action * jax.nn.sigmoid(h3)


if __name__ == "__main__":
    key = jax.random.PRNGKey(0)
    k_params, k_state = jax.random.split(key)

    batch = 8
    state_dim = 16
    action_dim = 4
    max_action = 2.0

    params = init_actor_params(k_params, state_dim, action_dim)
    prepared = prepare_actor_params(params)       # one-time cast/pad, off hot path
    state = jax.random.normal(k_state, (batch, state_dim), jnp.float32)

    out = jax.block_until_ready(actor_forward(state, prepared, max_action))
    assert out.shape == (batch, action_dim)

    # Tight check vs a reference using the same bf16 matmul inputs / epilogues.
    ref_bf16 = actor_ref_bf16(state, params, max_action)
    assert jnp.allclose(out, ref_bf16, atol=2e-2, rtol=2e-2), \
        "mismatch vs matched-bf16 reference"

    # Looser check vs exact f32 module semantics (error = bf16 rounding only).
    ref_f32 = actor_ref_f32(state, params, max_action)
    assert jnp.allclose(out, ref_f32, atol=5e-2, rtol=5e-2), \
        "mismatch vs f32 reference"

    print("KERNEL_OK")
</pallas_src>

<mosaic_0001>
module attributes {stable_mosaic.version = 11 : i64} {
  func.func @_actor_kernel(%arg0: i32, %arg1: memref<16x16xf32, #tpu.memory_space<vmem>>, %arg2: memref<16x256xbf16, #tpu.memory_space<vmem>>, %arg3: memref<1x256xbf16, #tpu.memory_space<vmem>>, %arg4: memref<256x256xbf16, #tpu.memory_space<vmem>>, %arg5: memref<1x256xbf16, #tpu.memory_space<vmem>>, %arg6: memref<256x128xbf16, #tpu.memory_space<vmem>>, %arg7: memref<1x4xf32, #tpu.memory_space<vmem>>, %arg8: memref<16x4xf32, #tpu.memory_space<vmem>>) attributes {dimension_semantics = [#tpu.dimension_semantics<parallel>], iteration_bounds = array<i64: 1>, scalar_prefetch = 0 : i64, scratch_operands = 0 : i64, tpu.core_type = #tpu.core_type<tc>, window_params = [{transform_indices = @transform_0, window_bounds = array<i64: 16, 16>}, {pipeline_mode = #tpu.pipeline_mode<synchronous>, transform_indices = @transform_1, window_bounds = array<i64: 16, 256>}, {pipeline_mode = #tpu.pipeline_mode<synchronous>, transform_indices = @transform_2, window_bounds = array<i64: 1, 256>}, {pipeline_mode = #tpu.pipeline_mode<synchronous>, transform_indices = @transform_3, window_bounds = array<i64: 256, 256>}, {pipeline_mode = #tpu.pipeline_mode<synchronous>, transform_indices = @transform_4, window_bounds = array<i64: 1, 256>}, {pipeline_mode = #tpu.pipeline_mode<synchronous>, transform_indices = @transform_5, window_bounds = array<i64: 256, 128>}, {pipeline_mode = #tpu.pipeline_mode<synchronous>, transform_indices = @transform_6, window_bounds = array<i64: 1, 4>}, {transform_indices = @transform_7, window_bounds = array<i64: 16, 4>}]} {
    %c0 = arith.constant 0 : index
    %c0_0 = arith.constant 0 : index
    %0 = vector.load %arg1[%c0, %c0_0] : memref<16x16xf32, #tpu.memory_space<vmem>>, vector<16x16xf32>
    %1 = arith.truncf %0 : vector<16x16xf32> to vector<16x16xbf16>
    %c0_1 = arith.constant 0 : index
    %c0_2 = arith.constant 0 : index
    %2 = vector.load %arg2[%c0_1, %c0_2] : memref<16x256xbf16, #tpu.memory_space<vmem>>, vector<16x256xbf16>
    %cst = arith.constant dense<0.000000e+00> : vector<16x256xf32>
    %3 = tpu.matmul %1, %2, %cst {dimension_numbers = #tpu.dot_dimension_numbers<[1], [0], [0], [1], [0, 0, 1, 1], [], []>} : vector<16x16xbf16>, vector<16x256xbf16>, vector<16x256xf32> -> vector<16x256xf32>
    %4 = arith.truncf %3 : vector<16x256xf32> to vector<16x256xbf16>
    %c0_3 = arith.constant 0 : index
    %c0_4 = arith.constant 0 : index
    %5 = vector.load %arg3[%c0_3, %c0_4] : memref<1x256xbf16, #tpu.memory_space<vmem>>, vector<1x256xbf16>
    %6 = vector.broadcast %5 : vector<1x256xbf16> to vector<16x256xbf16>
    %7 = arith.addf %4, %6 : vector<16x256xbf16>
    %cst_5 = arith.constant 0.000000e+00 : bf16
    %8 = vector.broadcast %cst_5 : bf16 to vector<16x256xbf16>
    %9 = arith.maximumf %7, %8 : vector<16x256xbf16>
    %c0_6 = arith.constant 0 : index
    %c0_7 = arith.constant 0 : index
    %10 = vector.load %arg4[%c0_6, %c0_7] : memref<256x256xbf16, #tpu.memory_space<vmem>>, vector<256x256xbf16>
    %cst_8 = arith.constant dense<0.000000e+00> : vector<16x256xf32>
    %11 = tpu.matmul %9, %10, %cst_8 {dimension_numbers = #tpu.dot_dimension_numbers<[1], [0], [0], [1], [0, 0, 1, 1], [], []>} : vector<16x256xbf16>, vector<256x256xbf16>, vector<16x256xf32> -> vector<16x256xf32>
    %12 = arith.truncf %11 : vector<16x256xf32> to vector<16x256xbf16>
    %c0_9 = arith.constant 0 : index
    %c0_10 = arith.constant 0 : index
    %13 = vector.load %arg5[%c0_9, %c0_10] : memref<1x256xbf16, #tpu.memory_space<vmem>>, vector<1x256xbf16>
    %14 = vector.broadcast %13 : vector<1x256xbf16> to vector<16x256xbf16>
    %15 = arith.addf %12, %14 : vector<16x256xbf16>
    %cst_11 = arith.constant 0.000000e+00 : bf16
    %16 = vector.broadcast %cst_11 : bf16 to vector<16x256xbf16>
    %17 = arith.maximumf %15, %16 : vector<16x256xbf16>
    %c0_12 = arith.constant 0 : index
    %c0_13 = arith.constant 0 : index
    %18 = vector.load %arg6[%c0_12, %c0_13] : memref<256x128xbf16, #tpu.memory_space<vmem>>, vector<256x128xbf16>
    %cst_14 = arith.constant dense<0.000000e+00> : vector<16x128xf32>
    %19 = tpu.matmul %17, %18, %cst_14 {dimension_numbers = #tpu.dot_dimension_numbers<[1], [0], [0], [1], [0, 0, 1, 1], [], []>} : vector<16x256xbf16>, vector<256x128xbf16>, vector<16x128xf32> -> vector<16x128xf32>
    %20 = vector.extract_strided_slice %19 {offsets = [0, 0], sizes = [16, 4], strides = [1, 1]} : vector<16x128xf32> to vector<16x4xf32>
    %c0_15 = arith.constant 0 : index
    %c0_16 = arith.constant 0 : index
    %21 = vector.load %arg7[%c0_15, %c0_16] : memref<1x4xf32, #tpu.memory_space<vmem>>, vector<1x4xf32>
    %22 = vector.broadcast %21 : vector<1x4xf32> to vector<16x4xf32>
    %23 = arith.addf %20, %22 : vector<16x4xf32>
    %cst_17 = arith.constant 0.000000e+00 : f32
    %24 = vector.broadcast %cst_17 : f32 to vector<16x4xf32>
    %25 = arith.subf %24, %23 : vector<16x4xf32>
    %26 = math.exp %25 : vector<16x4xf32>
    %cst_18 = arith.constant 1.000000e+00 : f32
    %27 = vector.broadcast %cst_18 : f32 to vector<16x4xf32>
    %28 = arith.addf %27, %26 : vector<16x4xf32>
    %cst_19 = arith.constant 1.000000e+00 : f32
    %29 = vector.broadcast %cst_19 : f32 to vector<16x4xf32>
    %30 = arith.divf %29, %28 : vector<16x4xf32>
    %cst_20 = arith.constant 2.000000e+00 : f32
    %31 = vector.broadcast %cst_20 : f32 to vector<16x4xf32>
    %32 = arith.mulf %31, %30 : vector<16x4xf32>
    %c0_21 = arith.constant 0 : index
    %c0_22 = arith.constant 0 : index
    %33 = vector.load %arg8[%c0_21, %c0_22] : memref<16x4xf32, #tpu.memory_space<vmem>>, vector<16x4xf32>
    tpu.vector_store %arg8[%c0_21, %c0_22], %32 {strides = array<i32>} : memref<16x4xf32, #tpu.memory_space<vmem>>, vector<16x4xf32>,
    return
  }
  func.func @transform_0(%arg0: i32) -> (i32, i32) {
    %c0_i32 = arith.constant 0 : i32
    %c0_i32_0 = arith.constant 0 : i32
    return %arg0, %c0_i32 : i32, i32
  }
  func.func @transform_1(%arg0: i32) -> (i32, i32) {
    %c0_i32 = arith.constant 0 : i32
    %c0_i32_0 = arith.constant 0 : i32
    %c0_i32_1 = arith.constant 0 : i32
    return %c0_i32, %c0_i32_0 : i32, i32
  }
  func.func @transform_2(%arg0: i32) -> (i32, i32) {
    %c0_i32 = arith.constant 0 : i32
    %c0_i32_0 = arith.constant 0 : i32
    %c0_i32_1 = arith.constant 0 : i32
    return %c0_i32, %c0_i32_0 : i32, i32
  }
  func.func @transform_3(%arg0: i32) -> (i32, i32) {
    %c0_i32 = arith.constant 0 : i32
    %c0_i32_0 = arith.constant 0 : i32
    %c0_i32_1 = arith.constant 0 : i32
    return %c0_i32, %c0_i32_0 : i32, i32
  }
  func.func @transform_4(%arg0: i32) -> (i32, i32) {
    %c0_i32 = arith.constant 0 : i32
    %c0_i32_0 = arith.constant 0 : i32
    %c0_i32_1 = arith.constant 0 : i32
    return %c0_i32, %c0_i32_0 : i32, i32
  }
  func.func @transform_5(%arg0: i32) -> (i32, i32) {
    %c0_i32 = arith.constant 0 : i32
    %c0_i32_0 = arith.constant 0 : i32
    %c0_i32_1 = arith.constant 0 : i32
    return %c0_i32, %c0_i32_0 : i32, i32
  }
  func.func @transform_6(%arg0: i32) -> (i32, i32) {
    %c0_i32 = arith.constant 0 : i32
    %c0_i32_0 = arith.constant 0 : i32
    %c0_i32_1 = arith.constant 0 : i32
    return %c0_i32, %c0_i32_0 : i32, i32
  }
  func.func @transform_7(%arg0: i32) -> (i32, i32) {
    %c0_i32 = arith.constant 0 : i32
    %c0_i32_0 = arith.constant 0 : i32
    return %arg0, %c0_i32 : i32, i32
  }
}

</mosaic_0001>

<bundles_post_ra>
// kernel: tpu_custom_call.1
= control target key start
LH: loop header
LB: loop body
LE: loop exit
PB: predicated region body
PF: predicated region fallthrough
CT: control target
= control target key end

     0   :  { %12 = vsyncpa [#allocation3], 0  ;;  %s1099_s0 = inlined_call_operand.hbm [shape: f32[8,16], index: 0, kind: input, shape index: {}]   ;;  %s1100_s1 = inlined_call_operand.hbm [shape: bf16[16,256], index: 1, kind: input, shape index: {}]   ;;  %s1101_s2 = inlined_call_operand.vmem [shape: bf16[1,256], index: 2, kind: input, shape index: {}]   ;;  %s1102_s3 = inlined_call_operand.hbm [shape: bf16[256,256], index: 3, kind: input, shape index: {}]   ;;  %s1103_s4 = inlined_call_operand.vmem [shape: bf16[1,256], index: 4, kind: input, shape index: {}]   ;;  %s1104_s5 = inlined_call_operand.hbm [shape: bf16[256,128], index: 5, kind: input, shape index: {}]   ;;  %s1105_s6 = inlined_call_operand.vmem [shape: f32[1,4], index: 6, kind: input, shape index: {}]   ;;  %s1106_s7 = inlined_call_operand.vmem [shape: f32[8,4], index: 7, kind: output, shape index: {}]  }
   0x1   :  { %13 = vsyncpa [#allocation5], 0 }
   0x2   :  { %14 = vsyncpa [#allocation8], 0 }
   0x3   :  { %19 = vsyncadd [#allocation3], 128  ;;  %s960_s24 = smov [#allocation4]   ;;  %s961_s26 = smov [#allocation2]  }
   0x4   :  { %s32_s25 = sshll.u32 %s960_s24, 4  ;;  %s20_s27 = sshll.u32 %s961_s26, 4  ;;  %s33_s25 = int_to_ptr.vmem [resolvable:$true] %s32_s25  ;;  %s1010_s27 = int_to_ptr.vmem [resolvable:$true] %s20_s27 }
   0x5   :  { %s866_s30 = scalar_lea.hbm %s1100_s1, 256 }
   0x6   :  { %p867_p0 = scmp.ne.s32.totalorder %s1100_s1, %s866_s30  ;;  %p870_p1 = scmp.lt.u32.totalorder %s866_s30, %s1100_s1 }
   0x8   :  { %p872_p2 = pnand %p870_p1, %p867_p0 }
   0xa   :  { %875 = shalt.err (!%p872_p2)
}
   0xb   :  { %s876_s12 = scalar_lea.vmem %s33_s25, 256  ;;  %p881_p4 = scmp.lt.s32.totalorder %s33_s25, %s33_s25 }
   0xc   :  { %p877_p3 = scmp.ne.s32.totalorder %s33_s25, %s876_s12  ;;  %p882_p5 = scmp.lt.s32.totalorder %s876_s12, %s876_s12 }
   0xe   :  { %p883_p6 = por %p882_p5, %p881_p4 }
  0x10   :  { %p884_p7 = pnand %p883_p6, %p877_p3 }
  0x12   :  { %887 = shalt.err (!%p884_p7)
}
  0x13   :  { %s962_s13 = smov 128   ;;  %s963_s14 = smov 8  }
  0x14   :  { %38 = dma.hbm_to_vmem [thread:$0]  %s1100_s1, 256, %s33_s25, [#allocation5], %s962_s13, %s962_s13, %s963_s14  }
  0x15   :  { %s888_s19 = scalar_lea.hbm %s1099_s0, 128 }
  0x16   :  { %p889_p8 = scmp.ne.s32.totalorder %s1099_s0, %s888_s19  ;;  %p892_p9 = scmp.lt.u32.totalorder %s888_s19, %s1099_s0 }
  0x18   :  { %p894_p10 = pnand %p892_p9, %p889_p8 }
  0x1a   :  { %897 = shalt.err (!%p894_p10)
}
  0x1b   :  { %s898_s24 = scalar_lea.vmem %s1010_s27, 128  ;;  %s902_s1 = scalar_lea.vmem %s1010_s27, 256 }
  0x1c   :  { %p899_p11 = scmp.ne.s32.totalorder %s1010_s27, %s898_s24  ;;  %p903_p12 = scmp.lt.s32.totalorder %s1010_s27, %s1010_s27 }
  0x1d   :  { %p904_p13 = scmp.lt.s32.totalorder %s902_s1, %s898_s24 }
  0x1f   :  { %p905_p0 = por %p904_p13, %p903_p12 }
  0x21   :  { %p906_p1 = pnand %p905_p0, %p899_p11 }
  0x23   :  { %909 = shalt.err (!%p906_p1)
}
  0x24   :  { %26 = dma.hbm_to_vmem [thread:$0]  %s1099_s0, 128, %s1010_s27, [#allocation3], %s962_s13, %s962_s13, %s963_s14  }
  0x25   :  { %s964_s28 = smov [#allocation6]   ;;  %s965_s30 = smov [#allocation7]  }
  0x26   :  { %s46_s29 = sshll.u32 %s964_s28, 4  ;;  %s60_s8 = sshll.u32 %s965_s30, 4  ;;  %s47_s29 = int_to_ptr.vmem [resolvable:$true] %s46_s29  ;;  %s1048_s8 = int_to_ptr.vmem [resolvable:$true] %s60_s8 }
  0x27   :  { %s910_s11 = scalar_lea.hbm %s1102_s3, 4096 }
  0x28   :  { %p911_p2 = scmp.ne.s32.totalorder %s1102_s3, %s910_s11  ;;  %p914_p3 = scmp.lt.u32.totalorder %s910_s11, %s1102_s3 }
  0x2a   :  { %p916_p4 = pnand %p914_p3, %p911_p2 }
  0x2c   :  { %919 = shalt.err (!%p916_p4)
}
  0x2d   :  { %s920_s0 = scalar_lea.vmem %s47_s29, 4096  ;;  %p925_p6 = scmp.lt.s32.totalorder %s47_s29, %s47_s29 }
  0x2e   :  { %p921_p5 = scmp.ne.s32.totalorder %s47_s29, %s920_s0  ;;  %p926_p7 = scmp.lt.s32.totalorder %s920_s0, %s920_s0 }
  0x30   :  { %p927_p8 = por %p926_p7, %p925_p6 }
  0x32   :  { %p928_p9 = pnand %p927_p8, %p921_p5 }
  0x34   :  { %931 = shalt.err (!%p928_p9)
}
  0x35   :  { %52 = dma.hbm_to_vmem [thread:$0]  %s1102_s3, 4096, %s47_s29, [#allocation5], %s962_s13, %s962_s13, %s963_s14  }
  0x36   :  { %s932_s21 = scalar_lea.hbm %s1104_s5, 2048 }
  0x37   :  { %p933_p10 = scmp.ne.s32.totalorder %s1104_s5, %s932_s21  ;;  %p936_p11 = scmp.lt.u32.totalorder %s932_s21, %s1104_s5 }
  0x39   :  { %p938_p12 = pnand %p936_p11, %p933_p10 }
  0x3b   :  { %941 = shalt.err (!%p938_p12)
}
  0x3c   :  { %s942_s25 = scalar_lea.vmem %s1048_s8, 2048  ;;  %p947_p0 = scmp.lt.s32.totalorder %s1048_s8, %s1048_s8 }
  0x3d   :  { %p943_p13 = scmp.ne.s32.totalorder %s1048_s8, %s942_s25  ;;  %p948_p1 = scmp.lt.s32.totalorder %s942_s25, %s942_s25 }
  0x3f   :  { %p949_p2 = por %p948_p1, %p947_p0 }
  0x41   :  { %p950_p3 = pnand %p949_p2, %p943_p13 }
  0x43   :  { %953 = shalt.err (!%p950_p3)
}
  0x44   :  { %s966_s3 = smov 64   ;;  %s967_s13 = smov 4  }
  0x45   :  { %66 = dma.hbm_to_vmem [thread:$0]  %s1104_s5, 2048, %s1048_s8, [#allocation8], %s966_s3, %s966_s3, %s967_s13  }
  0x46   :  { %954 = dma.done.wait [#allocation3], 256  }
  0x47   :  { %955 = vsyncadd [#allocation3], 4294967040 }
  0x48   :  { %956 = dma.done.wait [#allocation5], 4352  }
  0x49   :  { %957 = vsyncadd [#allocation5], 4294962944 }
  0x4a   :  { %958 = dma.done.wait [#allocation8], 2048  }
  0x4b   :  { %959 = vsyncadd [#allocation8], 4294965248  ;;  %v968_v0 = vmov 0   ;;  %v791_v1 = vld [vmem:[#allocation4 + $0x4] ss:$8 sps:$4 sm:$0xff]   ;;  %v82_v3 = vld [vmem:[#allocation2] sm:$0xff]  ;;  %v159_v51 = vlaneseq }
  0x4c   :  { %133 = vmatprep.mubr.bf16.mxu0 %v968_v0  ;;  %v793_v2 = vld [vmem:[#allocation4] ss:$8 sps:$4 sm:$0xff]   ;;  %v83_v4 = vld [vmem:[#allocation2 + $0x8] sm:$0xff]  ;;  %101 = vmatprep.subr.bf16.mxu0 %v791_v1  ;;  %vm97_vm0 = vcmask 130048   ;;  %v797_v8 = vld [vmem:[#allocation6 + $0x14] ss:$8 sps:$4 sm:$0xff]  }
  0x4d   :  { %v84_v5 = vpack.c.bf16 %v83_v4, %v82_v3  ;;  %v794_v6 = vld [vmem:[#allocation6 + $0x4] ss:$8 sps:$4 sm:$0xff]   ;;  %102 = vmatpush1.bf16.msra.mxu0 %v793_v2  ;;  %v796_v7 = vld [vmem:[#allocation6] ss:$8 sps:$4 sm:$0xff]   ;;  %v799_v9 = vld [vmem:[#allocation6 + $0x10] ss:$8 sps:$4 sm:$0xff]  }
  0x4e   :  { %380 = vmatprep.subr.bf16.mxu1 %v794_v6  ;;  %v800_v10 = vld [vmem:[#allocation6 + $0x24] ss:$8 sps:$4 sm:$0xff]   ;;  %v802_v11 = vld [vmem:[#allocation6 + $0x20] ss:$8 sps:$4 sm:$0xff]   ;;  %v803_v12 = vld [vmem:[#allocation6 + $0x34] ss:$8 sps:$4 sm:$0xff]  }
  0x4f   :  { %381 = vmatpush1.bf16.msra.mxu1 %v796_v7  ;;  %v805_v13 = vld [vmem:[#allocation6 + $0x30] ss:$8 sps:$4 sm:$0xff]   ;;  %v806_v14 = vld [vmem:[#allocation6 + $0x44] ss:$8 sps:$4 sm:$0xff]   ;;  %v808_v15 = vld [vmem:[#allocation6 + $0x40] ss:$8 sps:$4 sm:$0xff]  }
  0x50   :  { %707 = vmatmul.mubr.msk.bf16.vlgmr.msra.gmra.mrb[0].mxu0 %vm97_vm0, %v84_v5  ;;  %382 = vmatprep.subr.bf16.mxu1 %v797_v8  ;;  %v809_v16 = vld [vmem:[#allocation6 + $0x54] ss:$8 sps:$4 sm:$0xff]   ;;  %v811_v17 = vld [vmem:[#allocation6 + $0x50] ss:$8 sps:$4 sm:$0xff]   ;;  %v812_v18 = vld [vmem:[#allocation6 + $0x64] ss:$8 sps:$4 sm:$0xff]  }
  0x51   :  { %v814_v19 = vld [vmem:[#allocation6 + $0x60] ss:$8 sps:$4 sm:$0xff]   ;;  %v815_v20 = vld [vmem:[#allocation6 + $0x74] ss:$8 sps:$4 sm:$0xff]   ;;  %v817_v21 = vld [vmem:[#allocation6 + $0x70] ss:$8 sps:$4 sm:$0xff]  }
  0x52   :  { %v818_v22 = vld [vmem:[#allocation6 + $0x84] ss:$8 sps:$4 sm:$0xff]   ;;  %v820_v23 = vld [vmem:[#allocation6 + $0x80] ss:$8 sps:$4 sm:$0xff]   ;;  %v821_v24 = vld [vmem:[#allocation6 + $0x94] ss:$8 sps:$4 sm:$0xff]  }
  0x53   :  { %383 = vmatpush1.bf16.msra.mxu1 %v799_v9  ;;  %v823_v25 = vld [vmem:[#allocation6 + $0x90] ss:$8 sps:$4 sm:$0xff]   ;;  %v824_v26 = vld [vmem:[#allocation6 + $0xa4] ss:$8 sps:$4 sm:$0xff]   ;;  %v826_v27 = vld [vmem:[#allocation6 + $0xa0] ss:$8 sps:$4 sm:$0xff]  }
  0x54   :  { %384 = vmatprep.subr.bf16.mxu1 %v800_v10  ;;  %v827_v28 = vld [vmem:[#allocation6 + $0xb4] ss:$8 sps:$4 sm:$0xff]   ;;  %v829_v29 = vld [vmem:[#allocation6 + $0xb0] ss:$8 sps:$4 sm:$0xff]   ;;  %v830_v30 = vld [vmem:[#allocation6 + $0xc4] ss:$8 sps:$4 sm:$0xff]  }
  0x55   :  { %v832_v31 = vld [vmem:[#allocation6 + $0xc0] ss:$8 sps:$4 sm:$0xff]   ;;  %v833_v32 = vld [vmem:[#allocation6 + $0xd4] ss:$8 sps:$4 sm:$0xff]   ;;  %v835_v33 = vld [vmem:[#allocation6 + $0xd0] ss:$8 sps:$4 sm:$0xff]  }
  0x56   :  { %v836_v34 = vld [vmem:[#allocation6 + $0xe4] ss:$8 sps:$4 sm:$0xff]   ;;  %v838_v35 = vld [vmem:[#allocation6 + $0xe0] ss:$8 sps:$4 sm:$0xff]   ;;  %v839_v36 = vld [vmem:[#allocation6 + $0xf4] ss:$8 sps:$4 sm:$0xff]  }
  0x57   :  { %385 = vmatpush1.bf16.msra.mxu1 %v802_v11  ;;  %v841_v37 = vld [vmem:[#allocation6 + $0xf0] ss:$8 sps:$4 sm:$0xff]   ;;  %v842_v38 = vld [vmem:[#allocation7 + $0x40] sm:$0xff]   ;;  %v844_v40 = vld [vmem:[#allocation7 + $0x48] sm:$0xff]   ;;  %v969_v49 = vmov 1966171168  }
  0x58   :  { %386 = vmatprep.subr.bf16.mxu1 %v803_v12  ;;  %v843_v39 = vld [vmem:[#allocation7] sm:$0xff]   ;;  %759 = vmatprep.subr.bf16.mxu0 %v842_v38  ;;  %v845_v41 = vld [vmem:[#allocation7 + $0x8] sm:$0xff]   ;;  %v846_v42 = vld [vmem:[#allocation7 + $0x50] sm:$0xff]   ;;  %v157_v50 = vunpack.c.l.s4 %v969_v49  ;;  %v160_v53 = vshrl.u32 %v159_v51, 7  ;;  %vm659_vm1 = vcmask 31744  }
  0x59   :  { %760 = vmatpush3.bf16.msra.mxu0 %v843_v39  ;;  %v847_v43 = vld [vmem:[#allocation7 + $0x10] sm:$0xff]   ;;  %v848_v44 = vld [vmem:[#allocation7 + $0x58] sm:$0xff]   ;;  %v850_v46 = vld [vmem:[#allocation7 + $0x60] sm:$0xff]  }
  0x5a   :  { %761 = vmatprep.subr.bf16.mxu0 %v844_v40  ;;  %v849_v45 = vld [vmem:[#allocation7 + $0x18] sm:$0xff]   ;;  %v851_v47 = vld [vmem:[#allocation7 + $0x20] sm:$0xff]   ;;  %v852_v48 = vld [vmem:[#allocation7 + $0x68] sm:$0xff]   ;;  %v158_v52 = vunpack.c.0.s8 %v157_v50  ;;  %v175_v60 = vsub.s32 0, %v160_v53 }
  0x5b   :  { %387 = vmatpush1.bf16.msra.mxu1 %v805_v13  ;;  %v708_v54 = vld.sshfl [vmem:[%s1101_s2] sm:$0x11 pattern:$0x75316420]  ;;  %v853_v11 = vld [vmem:[#allocation7 + $0x28] sm:$0xff]   ;;  %v854_v12 = vld [vmem:[#allocation7 + $0x70] sm:$0xff]  }
  0x5c   :  { %388 = vmatprep.subr.bf16.mxu1 %v806_v14  ;;  %v161_v55 = vsub.s32 %v158_v52, %v160_v53  ;;  %v155_v56 = vcombine.high %v708_v54, %v708_v54  ;;  %v855_v13 = vld [vmem:[#allocation7 + $0x30] sm:$0xff]   ;;  %v856_v14 = vld [vmem:[#allocation7 + $0x78] sm:$0xff]  }
  0x5d   :  { %762 = vmatpush3.bf16.msra.mxu0 %v845_v41 }
  0x5e   :  { %763 = vmatprep.subr.bf16.mxu0 %v846_v42  ;;  %v162_v57 = vrot.slane %v708_v54, %v161_v55  ;;  %v169_v58 = vrot.slane %v155_v56, %v161_v55 }
  0x5f   :  { %389 = vmatpush1.bf16.msra.mxu1 %v808_v15  ;;  %v857_v15 = vld [vmem:[#allocation7 + $0x38] sm:$0xff]  }
  0x60   :  { %390 = vmatprep.subr.bf16.mxu1 %v809_v16  ;;  %v171_v59 = vpack.i.b16 %v162_v57, %v162_v57  ;;  %v178_v61 = vpack.i.b16 %v169_v58, %v169_v58  ;;  %v741_v16 = vld.sshfl [vmem:[%s1103_s4] sm:$0x11 pattern:$0x75316420] }
  0x61   :  { %764 = vmatpush3.bf16.msra.mxu0 %v847_v43 }
  0x62   :  { %765 = vmatprep.subr.bf16.mxu0 %v848_v44  ;;  %v176_v1 = vrot.slane %v171_v59, %v175_v60  ;;  %v183_v3 = vrot.slane %v178_v61, %v175_v60 }
  0x63   :  { %391 = vmatpush1.bf16.msra.mxu1 %v811_v17  ;;  %v434_v17 = vcombine.high %v741_v16, %v741_v16 }
  0x64   :  { %392 = vmatprep.subr.bf16.mxu1 %v812_v18  ;;  %v441_v18 = vrot.slane %v741_v16, %v161_v55 }
  0x65   :  { %766 = vmatpush3.bf16.msra.mxu0 %v849_v45 }
  0x66   :  { %767 = vmatprep.subr.bf16.mxu0 %v850_v46 }
  0x67   :  { %393 = vmatpush1.bf16.msra.mxu1 %v814_v19  ;;  %v448_v19 = vrot.slane %v434_v17, %v161_v55 }
  0x68   :  { %394 = vmatprep.subr.bf16.mxu1 %v815_v20  ;;  %v450_v20 = vpack.i.b16 %v441_v18, %v441_v18 }
  0x69   :  { %768 = vmatpush3.bf16.msra.mxu0 %v851_v47 }
  0x6a   :  { %769 = vmatprep.subr.bf16.mxu0 %v852_v48 }
  0x6b   :  { %395 = vmatpush1.bf16.msra.mxu1 %v817_v21  ;;  %v457_v21 = vpack.i.b16 %v448_v19, %v448_v19 }
  0x6c   :  { %396 = vmatprep.subr.bf16.mxu1 %v818_v22 }
  0x6d   :  { %770 = vmatpush3.bf16.msra.mxu0 %v853_v11 }
  0x6e   :  { %771 = vmatprep.subr.bf16.mxu0 %v854_v12 }
  0x6f   :  { %397 = vmatpush1.bf16.msra.mxu1 %v820_v23 }
  0x70   :  { %398 = vmatprep.subr.bf16.mxu1 %v821_v24  ;;  %v455_v24 = vrot.slane %v450_v20, %v175_v60 }
  0x71   :  { %772 = vmatpush3.bf16.msra.mxu0 %v855_v13 }
  0x72   :  { %773 = vmatprep.subr.bf16.mxu0 %v856_v14 }
  0x73   :  { %399 = vmatpush1.bf16.msra.mxu1 %v823_v25 }
  0x74   :  { %400 = vmatprep.subr.bf16.mxu1 %v824_v26  ;;  %v462_v26 = vrot.slane %v457_v21, %v175_v60 }
  0x75   :  { %774 = vmatpush3.bf16.msra.mxu0 %v857_v15 }
  0x77   :  { %401 = vmatpush1.bf16.msra.mxu1 %v826_v27 }
  0x78   :  { %402 = vmatprep.subr.bf16.mxu1 %v827_v28 }
  0x7b   :  { %403 = vmatpush1.bf16.msra.mxu1 %v829_v29 }
  0x7c   :  { %404 = vmatprep.subr.bf16.mxu1 %v830_v30 }
  0x7f   :  { %405 = vmatpush1.bf16.msra.mxu1 %v832_v31 }
  0x80   :  { %406 = vmatprep.subr.bf16.mxu1 %v833_v32 }
  0x83   :  { %407 = vmatpush1.bf16.msra.mxu1 %v835_v33 }
  0x84   :  { %408 = vmatprep.subr.bf16.mxu1 %v836_v34 }
  0x87   :  { %409 = vmatpush1.bf16.msra.mxu1 %v838_v35 }
  0x88   :  { %410 = vmatprep.subr.bf16.mxu1 %v839_v36  ;;  %v758_v36 = vld [vmem:[%s1105_s6] ss:$0 sm:$0xff] }
  0x8b   :  { %411 = vmatpush1.bf16.msra.mxu1 %v841_v37 }
 0x123   :  { %v135_v62 = vpop.f32.mrb[0].mxu0 }
 0x124   :  { %v137_v63 = vpop.f32.mrb[1].mxu0 }
 0x125   :  { %v139_v2 = vpop.f32.mrb[2].mxu0 }
 0x126   :  { %v144_v4 = vpack.c.bf16 %v139_v2, %v135_v62  ;;  %v141_v5 = vpop.f32.mrb[3].mxu0 }
 0x127   :  { %v145_v6 = vpack.c.bf16 %v141_v5, %v137_v63 }
 0x128   :  { %v184_v7 = vadd.bf16 %v176_v1, %v144_v4 }
 0x129   :  { %v185_v8 = vadd.bf16 %v183_v3, %v145_v6 }
 0x12a   :  { %v186_v10 = vmax.bf16 %v968_v0, %v184_v7 }
 0x12b   :  { %v187_v9 = vmax.bf16 %v968_v0, %v185_v8 }
 0x12d   :  { %412 = vmatprep.mubr.bf16.mxu1 %v187_v9 }
 0x12e   :  { %413 = vmatmul.mubr.bf16.vlgmr.msra.gmra.mrb[0].mxu1 %v186_v10 }
 0x201   :  { %v414_v22 = vpop.f32.mrb[0].mxu1 }
 0x202   :  { %v416_v23 = vpop.f32.mrb[1].mxu1 }
 0x203   :  { %v418_v25 = vpop.f32.mrb[2].mxu1 }
 0x204   :  { %v423_v27 = vpack.c.bf16 %v418_v25, %v414_v22  ;;  %v420_v28 = vpop.f32.mrb[3].mxu1 }
 0x205   :  { %v424_v29 = vpack.c.bf16 %v420_v28, %v416_v23 }
 0x206   :  { %v463_v30 = vadd.bf16 %v455_v24, %v423_v27 }
 0x207   :  { %v464_v31 = vadd.bf16 %v462_v26, %v424_v29 }
 0x208   :  { %v465_v33 = vmax.bf16 %v968_v0, %v463_v30 }
 0x209   :  { %v466_v32 = vmax.bf16 %v968_v0, %v464_v31 }
 0x20b   :  { %627 = vmatprep.mubr.bf16.mxu0 %v466_v32 }
 0x20c   :  { %628 = vmatmul.mubr.bf16.vlgmr.msra.gmra.mrb[4].mxu0 %v465_v33 }
 0x2df   :  { %v775_v34 = vpop.f32.mrb[4].mxu0 }
 0x2e0   :  { %v776_v35 = vpop.f32.mrb[5].mxu0 }
 0x2e1   :  { %v777_v37 = vadd.f32 %v776_v35, %v775_v34  ;;  %v778_v38 = vpop.f32.mrb[6].mxu0 }
 0x2e2   :  { %v779_v39 = vpop.f32.mrb[7].mxu0 }
 0x2e3   :  { %v643_v40 = vadd.f32 %v777_v37, %v758_v36  ;;  %v780_v41 = vadd.f32 %v779_v39, %v778_v38 }
 0x2e5   :  { %v645_v42 = vsub.f32 0.0, %v643_v40  ;;  %v644_v43 = vadd.f32 %v780_v41, %v758_v36 }
 0x2e7   :  { %v647_v44 = vmul.f32 1.442695, %v645_v42  ;;  %v646_v45 = vsub.f32 0.0, %v644_v43 }
 0x2e9   :  { %858 = vpow2.f32 %v647_v44  ;;  %v649_v46 = vmul.f32 1.442695, %v646_v45 }
 0x2eb   :  { %860 = vpow2.f32 %v649_v46 }
 0x2f3   :  { %v859_v0 = vpop.eup %858 }
 0x2f4   :  { %v651_v47 = vadd.f32 1.0, %v859_v0 }
 0x2f5   :  { %v861_v48 = vpop.eup %860 }
 0x2f6   :  { %862 = vrcp.f32 %v651_v47  ;;  %v652_v49 = vadd.f32 1.0, %v861_v48 }
 0x2f8   :  { %864 = vrcp.f32 %v652_v49 }
 0x300   :  { %v863_v50 = vpop.eup %862 }
 0x301   :  { %v657_v51 = vmul.f32 2.0, %v863_v50 }
 0x302   :  { %v865_v52 = vpop.eup %864 }
 0x303   :  { %660 = vst.msk [vmem:[#allocation9] sm:$0xff] %vm659_vm1, %v657_v51 }
 0x30a   :  { %v691_v53 = vld [vmem:[#allocation9] sm:$0xff] }
 0x30b   :  { %692 = vst [vmem:[%s1106_s7] sm:$0xff] %v691_v53 }
 0x30c   :  { %698 = vsyncpa [#allocation3], 1 }
 0x30d   :  { %699 = vsyncpa [#allocation5], 1 }
 0x30e   :  { %700 = vsyncpa [#allocation8], 1 }

</bundles_post_ra>
